<compile_context>
chip_gen: v5e
topology: v5e:2x2
jax: 0.10.0
libtpu: 0.0.40
codegen_flags: <defaults>
</compile_context>

<pallas_src>
import numpy as np
import jax
import jax.numpy as jnp
from jax.experimental import pallas as pl
from jax.experimental.pallas import tpu as pltpu

_H1, _H2, _H3, _OUT = 256, 128, 64, 1


def _round_up(n, m):
    return ((n + m - 1) // m) * m


def _leaky_relu(v, negative_slope=0.2):
    return jnp.where(v > 0, v, negative_slope * v)


def _discriminator_kernel(xT_ref,
                          w1_ref, b1_ref,
                          w2_ref, b2_ref,
                          w3_ref, b3_ref,
                          w4_ref, b4_ref,
                          o_ref):
    # Transposed MLP: h_T = W @ x_T + b.  bf16 operands on the MXU with f32
    # accumulation; bias add / LeakyReLU / sigmoid in f32 on the VPU / EUP.
    xT = xT_ref[...].astype(jnp.bfloat16)                           # [d_in, tile]

    h = jnp.dot(w1_ref[...], xT, preferred_element_type=jnp.float32) + b1_ref[...]
    h = _leaky_relu(h)                                              # [256, tile] f32

    h = jnp.dot(w2_ref[...], h.astype(jnp.bfloat16),
                preferred_element_type=jnp.float32) + b2_ref[...]
    h = _leaky_relu(h)                                              # [128, tile]

    h = jnp.dot(w3_ref[...], h.astype(jnp.bfloat16),
                preferred_element_type=jnp.float32) + b3_ref[...]
    h = _leaky_relu(h)                                              # [64, tile]

    # w4 is zero-padded to 8 output rows (sublane multiple); row 0 is real.
    logits8 = jnp.dot(w4_ref[...], h.astype(jnp.bfloat16),
                      preferred_element_type=jnp.float32)           # [8, tile]
    logits = logits8[0:1, :] + b4_ref[...]                          # [1, tile]

    # Sigmoid only on the real logit row; lane-dense [1, tile] store.
    o_ref[...] = jax.nn.sigmoid(logits).astype(o_ref.dtype)


def pack_params(params):
    """Pack PyTorch-layout params ([out, in] weights, [out] biases) for the kernel.

    Weights are cast to bf16 and kept in the [out, in] layout (the transposed
    kernel consumes them directly, no lane padding of the input dim).  Biases
    become f32 [out, 1] columns.  Only the last layer's weight is zero-padded
    1 -> 8 output rows for sublane alignment; padded rows never reach row 0.
    """
    (w1, b1), (w2, b2), (w3, b3), (w4, b4) = params

    def bcol(b):
        return jnp.asarray(b, jnp.float32).reshape(-1, 1)

    w4p = jnp.zeros((8, w4.shape[1]), jnp.float32).at[:1, :].set(w4)
    return (
        (jnp.asarray(w1, jnp.bfloat16), bcol(b1)),
        (jnp.asarray(w2, jnp.bfloat16), bcol(b2)),
        (jnp.asarray(w3, jnp.bfloat16), bcol(b3)),
        (w4p.astype(jnp.bfloat16), bcol(b4)),
    )


def discriminator_forward(x, packed_params, *, batch_tile=1024, min_grid_steps=1,
                          vmem_limit_bytes=None):
    """x: [B, input_dim] float32 -> [B, 1] float32 sigmoid probabilities.

    batch_tile: examples per grid step (rounded to a multiple of 128).
    min_grid_steps: leave at 1 on single-TensorCore chips (v5e / v6e); set to
        >= 4 on v7x so megacore sharding still pipelines per core.
    """
    B, d_in = x.shape
    (w1, b1), (w2, b2), (w3, b3), (w4, b4) = packed_params
    assert w1.shape[1] == d_in, "input_dim does not match packed params"

    # Batch tile: multiple of 128 (examples live on the lane axis), capped at
    # the padded batch size.
    tile = min(_round_up(max(batch_tile, 128), 128), _round_up(B, 128))
    if min_grid_steps > 1:
        tile = max(128, min(tile, _round_up(-(-B // min_grid_steps), 128)))
    b_pad = _round_up(B, tile)

    # One fused pre-pass: cast to bf16, transpose to [d_in, b_pad], pad the
    # batch dim only.  No f32 copy, no lane padding of the feature dim.
    x_t = jnp.transpose(x.astype(jnp.bfloat16))
    if b_pad != B:
        x_t = jnp.pad(x_t, ((0, 0), (0, b_pad - B)))

    grid = (b_pad // tile,)
    const = lambda i: (0, 0)
    in_specs = [
        pl.BlockSpec((d_in, tile), lambda i: (0, i)),   # x^T, batch-tiled on lanes
        pl.BlockSpec(w1.shape, const), pl.BlockSpec(b1.shape, const),
        pl.BlockSpec(w2.shape, const), pl.BlockSpec(b2.shape, const),
        pl.BlockSpec(w3.shape, const), pl.BlockSpec(b3.shape, const),
        pl.BlockSpec(w4.shape, const), pl.BlockSpec(b4.shape, const),
    ]
    out_spec = pl.BlockSpec((1, tile), lambda i: (0, i))

    if vmem_limit_bytes is None and tile >= 2048:
        # Large tiles: f32 activations + double-buffered x tiles can exceed the
        # 16 MiB default scoped VMEM on v5e.  Still below v7x's 64 MiB physical.
        vmem_limit_bytes = 64 * 1024 * 1024

    out = pl.pallas_call(
        _discriminator_kernel,
        out_shape=jax.ShapeDtypeStruct((1, b_pad), jnp.float32),
        grid_spec=pltpu.PrefetchScalarGridSpec(
            num_scalar_prefetch=0,
            grid=grid,
            in_specs=in_specs,
            out_specs=out_spec,
        ),
        compiler_params=pltpu.CompilerParams(
            dimension_semantics=("parallel",),
            vmem_limit_bytes=vmem_limit_bytes,
        ),
    )(x_t, w1, b1, w2, b2, w3, b3, w4, b4)

    return out[0, :B].reshape(B, 1)


def init_discriminator_params(key, input_dim):
    """PyTorch nn.Linear-style init (U[-1/sqrt(fan_in), +1/sqrt(fan_in)]).

    Weights are in the PyTorch layout [out_features, in_features]; biases [out].
    """
    dims = [input_dim, _H1, _H2, _H3, _OUT]
    params = []
    for i in range(4):
        fan_in, fan_out = dims[i], dims[i + 1]
        key, kw, kb = jax.random.split(key, 3)
        bound = 1.0 / float(np.sqrt(fan_in))
        w = jax.random.uniform(kw, (fan_out, fan_in), jnp.float32, -bound, bound)
        b = jax.random.uniform(kb, (fan_out,), jnp.float32, -bound, bound)
        params.append((w, b))
    return params


def _reference_forward(x, params):
    h = x
    for i, (w, b) in enumerate(params):
        h = h @ w.T + b
        if i < 3:
            h = jnp.where(h > 0, h, 0.2 * h)
    return jax.nn.sigmoid(h)


if __name__ == "__main__":
    key = jax.random.PRNGKey(0)
    k_x, k_p = jax.random.split(key)

    batch = 8
    input_dim = 32
    x = jax.random.normal(k_x, (batch, input_dim), jnp.float32)
    params = init_discriminator_params(k_p, input_dim)
    packed = pack_params(params)

    out = discriminator_forward(x, packed)
    out = jax.block_until_ready(out)

    ref = _reference_forward(x, params)
    assert out.shape == (batch, 1), out.shape
    max_err = float(jnp.max(jnp.abs(out - ref)))
    # bf16 operands / f32 accumulation vs full-f32 reference -> loose tolerance.
    assert max_err < 2e-2, f"max abs err = {max_err}"

    print("KERNEL_OK")
</pallas_src>

<mosaic_0001>
module attributes {stable_mosaic.version = 11 : i64} {
  func.func @_discriminator_kernel(%arg0: i32, %arg1: memref<32x128xbf16, #tpu.memory_space<vmem>>, %arg2: memref<256x32xbf16, #tpu.memory_space<vmem>>, %arg3: memref<256x1xf32, #tpu.memory_space<vmem>>, %arg4: memref<128x256xbf16, #tpu.memory_space<vmem>>, %arg5: memref<128x1xf32, #tpu.memory_space<vmem>>, %arg6: memref<64x128xbf16, #tpu.memory_space<vmem>>, %arg7: memref<64x1xf32, #tpu.memory_space<vmem>>, %arg8: memref<8x64xbf16, #tpu.memory_space<vmem>>, %arg9: memref<1x1xf32, #tpu.memory_space<vmem>>, %arg10: memref<1x128xf32, #tpu.memory_space<vmem>>) attributes {dimension_semantics = [#tpu.dimension_semantics<parallel>], iteration_bounds = array<i64: 1>, scalar_prefetch = 0 : i64, scratch_operands = 0 : i64, tpu.core_type = #tpu.core_type<tc>, window_params = [{transform_indices = @transform_0, window_bounds = array<i64: 32, 128>}, {pipeline_mode = #tpu.pipeline_mode<synchronous>, transform_indices = @transform_1, window_bounds = array<i64: 256, 32>}, {pipeline_mode = #tpu.pipeline_mode<synchronous>, transform_indices = @transform_2, window_bounds = array<i64: 256, 1>}, {pipeline_mode = #tpu.pipeline_mode<synchronous>, transform_indices = @transform_3, window_bounds = array<i64: 128, 256>}, {pipeline_mode = #tpu.pipeline_mode<synchronous>, transform_indices = @transform_4, window_bounds = array<i64: 128, 1>}, {pipeline_mode = #tpu.pipeline_mode<synchronous>, transform_indices = @transform_5, window_bounds = array<i64: 64, 128>}, {pipeline_mode = #tpu.pipeline_mode<synchronous>, transform_indices = @transform_6, window_bounds = array<i64: 64, 1>}, {pipeline_mode = #tpu.pipeline_mode<synchronous>, transform_indices = @transform_7, window_bounds = array<i64: 8, 64>}, {pipeline_mode = #tpu.pipeline_mode<synchronous>, transform_indices = @transform_8, window_bounds = array<i64: 1, 1>}, {transform_indices = @transform_9, window_bounds = array<i64: 1, 128>}]} {
    %c0 = arith.constant 0 : index
    %c0_0 = arith.constant 0 : index
    %0 = vector.load %arg1[%c0, %c0_0] : memref<32x128xbf16, #tpu.memory_space<vmem>>, vector<32x128xbf16>
    %c0_1 = arith.constant 0 : index
    %c0_2 = arith.constant 0 : index
    %1 = vector.load %arg2[%c0_1, %c0_2] : memref<256x32xbf16, #tpu.memory_space<vmem>>, vector<256x32xbf16>
    %cst = arith.constant dense<0.000000e+00> : vector<256x128xf32>
    %2 = tpu.matmul %1, %0, %cst {dimension_numbers = #tpu.dot_dimension_numbers<[1], [0], [0], [1], [0, 0, 1, 1], [], []>} : vector<256x32xbf16>, vector<32x128xbf16>, vector<256x128xf32> -> vector<256x128xf32>
    %c0_3 = arith.constant 0 : index
    %c0_4 = arith.constant 0 : index
    %3 = vector.load %arg3[%c0_3, %c0_4] : memref<256x1xf32, #tpu.memory_space<vmem>>, vector<256x1xf32>
    %4 = vector.broadcast %3 : vector<256x1xf32> to vector<256x128xf32>
    %5 = arith.addf %2, %4 : vector<256x128xf32>
    %cst_5 = arith.constant 0.000000e+00 : f32
    %6 = vector.broadcast %cst_5 : f32 to vector<256x128xf32>
    %7 = arith.cmpf ogt, %5, %6 : vector<256x128xf32>
    %cst_6 = arith.constant 2.000000e-01 : f32
    %8 = vector.broadcast %cst_6 : f32 to vector<256x128xf32>
    %9 = arith.mulf %8, %5 : vector<256x128xf32>
    %10 = arith.select %7, %5, %9 : vector<256x128xi1>, vector<256x128xf32>
    %c0_7 = arith.constant 0 : index
    %c0_8 = arith.constant 0 : index
    %11 = vector.load %arg4[%c0_7, %c0_8] : memref<128x256xbf16, #tpu.memory_space<vmem>>, vector<128x256xbf16>
    %12 = arith.truncf %10 : vector<256x128xf32> to vector<256x128xbf16>
    %cst_9 = arith.constant dense<0.000000e+00> : vector<128x128xf32>
    %13 = tpu.matmul %11, %12, %cst_9 {dimension_numbers = #tpu.dot_dimension_numbers<[1], [0], [0], [1], [0, 0, 1, 1], [], []>} : vector<128x256xbf16>, vector<256x128xbf16>, vector<128x128xf32> -> vector<128x128xf32>
    %c0_10 = arith.constant 0 : index
    %c0_11 = arith.constant 0 : index
    %14 = vector.load %arg5[%c0_10, %c0_11] : memref<128x1xf32, #tpu.memory_space<vmem>>, vector<128x1xf32>
    %15 = vector.broadcast %14 : vector<128x1xf32> to vector<128x128xf32>
    %16 = arith.addf %13, %15 : vector<128x128xf32>
    %cst_12 = arith.constant 0.000000e+00 : f32
    %17 = vector.broadcast %cst_12 : f32 to vector<128x128xf32>
    %18 = arith.cmpf ogt, %16, %17 : vector<128x128xf32>
    %cst_13 = arith.constant 2.000000e-01 : f32
    %19 = vector.broadcast %cst_13 : f32 to vector<128x128xf32>
    %20 = arith.mulf %19, %16 : vector<128x128xf32>
    %21 = arith.select %18, %16, %20 : vector<128x128xi1>, vector<128x128xf32>
    %c0_14 = arith.constant 0 : index
    %c0_15 = arith.constant 0 : index
    %22 = vector.load %arg6[%c0_14, %c0_15] : memref<64x128xbf16, #tpu.memory_space<vmem>>, vector<64x128xbf16>
    %23 = arith.truncf %21 : vector<128x128xf32> to vector<128x128xbf16>
    %cst_16 = arith.constant dense<0.000000e+00> : vector<64x128xf32>
    %24 = tpu.matmul %22, %23, %cst_16 {dimension_numbers = #tpu.dot_dimension_numbers<[1], [0], [0], [1], [0, 0, 1, 1], [], []>} : vector<64x128xbf16>, vector<128x128xbf16>, vector<64x128xf32> -> vector<64x128xf32>
    %c0_17 = arith.constant 0 : index
    %c0_18 = arith.constant 0 : index
    %25 = vector.load %arg7[%c0_17, %c0_18] : memref<64x1xf32, #tpu.memory_space<vmem>>, vector<64x1xf32>
    %26 = vector.broadcast %25 : vector<64x1xf32> to vector<64x128xf32>
    %27 = arith.addf %24, %26 : vector<64x128xf32>
    %cst_19 = arith.constant 0.000000e+00 : f32
    %28 = vector.broadcast %cst_19 : f32 to vector<64x128xf32>
    %29 = arith.cmpf ogt, %27, %28 : vector<64x128xf32>
    %cst_20 = arith.constant 2.000000e-01 : f32
    %30 = vector.broadcast %cst_20 : f32 to vector<64x128xf32>
    %31 = arith.mulf %30, %27 : vector<64x128xf32>
    %32 = arith.select %29, %27, %31 : vector<64x128xi1>, vector<64x128xf32>
    %c0_21 = arith.constant 0 : index
    %c0_22 = arith.constant 0 : index
    %33 = vector.load %arg8[%c0_21, %c0_22] : memref<8x64xbf16, #tpu.memory_space<vmem>>, vector<8x64xbf16>
    %34 = arith.truncf %32 : vector<64x128xf32> to vector<64x128xbf16>
    %cst_23 = arith.constant dense<0.000000e+00> : vector<8x128xf32>
    %35 = tpu.matmul %33, %34, %cst_23 {dimension_numbers = #tpu.dot_dimension_numbers<[1], [0], [0], [1], [0, 0, 1, 1], [], []>} : vector<8x64xbf16>, vector<64x128xbf16>, vector<8x128xf32> -> vector<8x128xf32>
    %36 = vector.extract_strided_slice %35 {offsets = [0, 0], sizes = [1, 128], strides = [1, 1]} : vector<8x128xf32> to vector<1x128xf32>
    %c0_24 = arith.constant 0 : index
    %c0_25 = arith.constant 0 : index
    %37 = vector.load %arg9[%c0_24, %c0_25] : memref<1x1xf32, #tpu.memory_space<vmem>>, vector<1x1xf32>
    %38 = vector.broadcast %37 : vector<1x1xf32> to vector<1x128xf32>
    %39 = arith.addf %36, %38 : vector<1x128xf32>
    %40 = arith.negf %39 : vector<1x128xf32>
    %41 = math.exp %40 : vector<1x128xf32>
    %cst_26 = arith.constant 1.000000e+00 : f32
    %42 = vector.broadcast %cst_26 : f32 to vector<1x128xf32>
    %43 = arith.addf %42, %41 : vector<1x128xf32>
    %44 = arith.divf %42, %43 : vector<1x128xf32>
    %c0_27 = arith.constant 0 : index
    %c0_28 = arith.constant 0 : index
    %45 = vector.load %arg10[%c0_27, %c0_28] : memref<1x128xf32, #tpu.memory_space<vmem>>, vector<1x128xf32>
    tpu.vector_store %arg10[%c0_27, %c0_28], %44 {strides = array<i32>} : memref<1x128xf32, #tpu.memory_space<vmem>>, vector<1x128xf32>,
    return
  }
  func.func @transform_0(%arg0: i32) -> (i32, i32) {
    %c0_i32 = arith.constant 0 : i32
    %c0_i32_0 = arith.constant 0 : i32
    return %c0_i32, %arg0 : i32, i32
  }
  func.func @transform_1(%arg0: i32) -> (i32, i32) {
    %c0_i32 = arith.constant 0 : i32
    %c0_i32_0 = arith.constant 0 : i32
    %c0_i32_1 = arith.constant 0 : i32
    return %c0_i32, %c0_i32_0 : i32, i32
  }
  func.func @transform_2(%arg0: i32) -> (i32, i32) {
    %c0_i32 = arith.constant 0 : i32
    %c0_i32_0 = arith.constant 0 : i32
    %c0_i32_1 = arith.constant 0 : i32
    return %c0_i32, %c0_i32_0 : i32, i32
  }
  func.func @transform_3(%arg0: i32) -> (i32, i32) {
    %c0_i32 = arith.constant 0 : i32
    %c0_i32_0 = arith.constant 0 : i32
    %c0_i32_1 = arith.constant 0 : i32
    return %c0_i32, %c0_i32_0 : i32, i32
  }
  func.func @transform_4(%arg0: i32) -> (i32, i32) {
    %c0_i32 = arith.constant 0 : i32
    %c0_i32_0 = arith.constant 0 : i32
    %c0_i32_1 = arith.constant 0 : i32
    return %c0_i32, %c0_i32_0 : i32, i32
  }
  func.func @transform_5(%arg0: i32) -> (i32, i32) {
    %c0_i32 = arith.constant 0 : i32
    %c0_i32_0 = arith.constant 0 : i32
    %c0_i32_1 = arith.constant 0 : i32
    return %c0_i32, %c0_i32_0 : i32, i32
  }
  func.func @transform_6(%arg0: i32) -> (i32, i32) {
    %c0_i32 = arith.constant 0 : i32
    %c0_i32_0 = arith.constant 0 : i32
    %c0_i32_1 = arith.constant 0 : i32
    return %c0_i32, %c0_i32_0 : i32, i32
  }
  func.func @transform_7(%arg0: i32) -> (i32, i32) {
    %c0_i32 = arith.constant 0 : i32
    %c0_i32_0 = arith.constant 0 : i32
    %c0_i32_1 = arith.constant 0 : i32
    return %c0_i32, %c0_i32_0 : i32, i32
  }
  func.func @transform_8(%arg0: i32) -> (i32, i32) {
    %c0_i32 = arith.constant 0 : i32
    %c0_i32_0 = arith.constant 0 : i32
    %c0_i32_1 = arith.constant 0 : i32
    return %c0_i32, %c0_i32_0 : i32, i32
  }
  func.func @transform_9(%arg0: i32) -> (i32, i32) {
    %c0_i32 = arith.constant 0 : i32
    %c0_i32_0 = arith.constant 0 : i32
    return %c0_i32, %arg0 : i32, i32
  }
}

</mosaic_0001>

<bundles_post_ra>
// kernel: tpu_custom_call.1
= control target key start
LH: loop header
LB: loop body
LE: loop exit
PB: predicated region body
PF: predicated region fallthrough
CT: control target
= control target key end

     0   :  { %s1980_s0 = inlined_call_operand.vmem [shape: bf16[32,128], index: 0, kind: input, shape index: {}]   ;;  %s1981_s1 = inlined_call_operand.vmem [shape: bf16[256,32], index: 1, kind: input, shape index: {}]   ;;  %s1982_s2 = inlined_call_operand.vmem [shape: f32[256,1], index: 2, kind: input, shape index: {}]   ;;  %s1983_s3 = inlined_call_operand.vmem [shape: bf16[128,256], index: 3, kind: input, shape index: {}]   ;;  %s1984_s4 = inlined_call_operand.vmem [shape: f32[128,1], index: 4, kind: input, shape index: {}]   ;;  %s1985_s5 = inlined_call_operand.vmem [shape: bf16[64,128], index: 5, kind: input, shape index: {}]   ;;  %s1986_s6 = inlined_call_operand.vmem [shape: f32[64,1], index: 6, kind: input, shape index: {}]   ;;  %s1987_s7 = inlined_call_operand.vmem [shape: bf16[8,64], index: 7, kind: input, shape index: {}]   ;;  %s1988_s8 = inlined_call_operand.<no memory space> [shape: f32[1,1], index: 8, kind: input, shape index: {}]   ;;  %s1989_s9 = inlined_call_operand.hbm [shape: f32[1,128], index: 9, kind: output, shape index: {}]  }
   0x1   :  { %v14_v0 = vstv %s1988_s8 }
   0x2   :  { %15 = vst [vmem:[#allocation2] sm:$0x1] %v14_v0 }
   0x3   :  { %v102_v1 = vld [vmem:[%s1982_s2 + $0xf0] sm:$0xff]  ;;  %v100_v2 = vld [vmem:[%s1982_s2 + $0xe0] sm:$0xff]  ;;  %v1404_v4 = vmov 0   ;;  %v1322_v5 = vld [vmem:[%s1980_s0 + $0x8] sm:$0xff] }
   0x4   :  { %v86_v3 = vld [vmem:[%s1982_s2 + $0x70] sm:$0xff]  ;;  %1373 = vset.pattern.permute.xlu2 %v1404_v4  ;;  %1372 = vset.pattern.permute.xlu1 %v1404_v4  ;;  %v1321_v6 = vld [vmem:[%s1980_s0] sm:$0xff]  ;;  %v103_v7 = vld [vmem:[%s1982_s2 + $0xf8] sm:$0xff] }
   0x5   :  { %1371 = vset.pattern.permute.xlu0 %v1404_v4  ;;  %246 = vperm.xlu2 %1373, %v100_v2   ;;  %v101_v8 = vld [vmem:[%s1982_s2 + $0xe8] sm:$0xff] }
   0x6   :  { %256 = vperm.xlu0 %1371, %v102_v1   ;;  %176 = vperm.xlu1 %1372, %v86_v3  }
   0x7   :  { %411 = vmatpush.bf16.msra.mxu0 %v1322_v5  ;;  %1359 = vmatpush.bf16.msra.mxu3 %v1322_v5 }
   0x8   :  { %16 = vsyncpa [#allocation4], 0  ;;  %v87_v9 = vld [vmem:[%s1982_s2 + $0x78] sm:$0xff]  ;;  %v1323_v10 = vld [vmem:[%s1981_s1] sm:$0xff]  ;;  %vm356_vm0 = vcmask 261120   ;;  %s1142_s12 = sshll.u32 %s1989_s9, 4  ;;  %s1143_s12 = int_to_ptr.hbm [resolvable:$true] %s1142_s12 }
   0x9   :  { %v1333_v11 = vld [vmem:[%s1981_s1 + $0x50] sm:$0xff]  ;;  %v85_v13 = vld [vmem:[%s1982_s2 + $0x68] sm:$0xff]  ;;  %v84_v14 = vld [vmem:[%s1982_s2 + $0x60] sm:$0xff] }
   0xa   :  { %v98_v12 = vld [vmem:[%s1982_s2 + $0xd0] sm:$0xff]  ;;  %v99_v15 = vld [vmem:[%s1982_s2 + $0xd8] sm:$0xff]  ;;  %v1324_v18 = vld [vmem:[%s1981_s1 + $0x8] sm:$0xff] }
   0xb   :  { %412 = vmatpush.bf16.msra.mxu0 %v1321_v6  ;;  %1360 = vmatpush.bf16.msra.mxu3 %v1321_v6  ;;  %v83_v16 = vld [vmem:[%s1982_s2 + $0x58] sm:$0xff]  ;;  %v82_v17 = vld [vmem:[%s1982_s2 + $0x50] sm:$0xff]  ;;  %v80_v20 = vld [vmem:[%s1982_s2 + $0x40] sm:$0xff] }
   0xc   :  { %v1334_v19 = vld [vmem:[%s1981_s1 + $0x58] sm:$0xff]  ;;  %v96_v21 = vld [vmem:[%s1982_s2 + $0xc0] sm:$0xff]  ;;  %v97_v22 = vld [vmem:[%s1982_s2 + $0xc8] sm:$0xff] }
   0xd   :  { %251 = vperm.xlu2 %1373, %v101_v8   ;;  %v94_v23 = vld [vmem:[%s1982_s2 + $0xb0] sm:$0xff]  ;;  %v95_v24 = vld [vmem:[%s1982_s2 + $0xb8] sm:$0xff]  ;;  %v81_v25 = vld [vmem:[%s1982_s2 + $0x48] sm:$0xff] }
   0xe   :  { %261 = vperm.xlu0 %1371, %v103_v7   ;;  %181 = vperm.xlu1 %1372, %v87_v9   ;;  %v1325_v26 = vld [vmem:[%s1981_s1 + $0x10] sm:$0xff]  ;;  %v1335_v27 = vld [vmem:[%s1981_s1 + $0x60] sm:$0xff]  ;;  %v79_v29 = vld [vmem:[%s1982_s2 + $0x38] sm:$0xff] }
   0xf   :  { %1223 = vmatmul.msk.bf16.vlgmr.msra.gmra.mxu0 %vm356_vm0, %v1323_v10  ;;  %1233 = vmatmul.msk.bf16.vlgmr.msra.gmra.mxu3 %vm356_vm0, %v1333_v11  ;;  %v92_v28 = vld [vmem:[%s1982_s2 + $0xa0] sm:$0xff]  ;;  %v78_v30 = vld [vmem:[%s1982_s2 + $0x30] sm:$0xff]  ;;  %v93_v31 = vld [vmem:[%s1982_s2 + $0xa8] sm:$0xff] }
  0x10   :  { %v77_v32 = vld [vmem:[%s1982_s2 + $0x28] sm:$0xff]  ;;  %v76_v33 = vld [vmem:[%s1982_s2 + $0x20] sm:$0xff]  ;;  %v1326_v34 = vld [vmem:[%s1981_s1 + $0x18] sm:$0xff] }
  0x11   :  { %v1336_v35 = vld [vmem:[%s1981_s1 + $0x68] sm:$0xff]  ;;  %v74_v36 = vld [vmem:[%s1982_s2 + $0x10] sm:$0xff]  ;;  %v91_v38 = vld [vmem:[%s1982_s2 + $0x98] sm:$0xff] }
  0x12   :  { %v90_v37 = vld [vmem:[%s1982_s2 + $0x90] sm:$0xff]  ;;  %v88_v39 = vld [vmem:[%s1982_s2 + $0x80] sm:$0xff]  ;;  %v89_v40 = vld [vmem:[%s1982_s2 + $0x88] sm:$0xff] }
  0x13   :  { %v75_v41 = vld [vmem:[%s1982_s2 + $0x18] sm:$0xff]  ;;  %v1327_v42 = vld [vmem:[%s1981_s1 + $0x20] sm:$0xff]  ;;  %v1337_v43 = vld [vmem:[%s1981_s1 + $0x70] sm:$0xff] }
  0x14   :  { %v636_v44 = vld [vmem:[%s1984_s4 + $0x70] sm:$0xff]  ;;  %v73_v45 = vld [vmem:[%s1982_s2 + $0x8] sm:$0xff]  ;;  %v72_v46 = vld [vmem:[%s1982_s2] sm:$0xff] }
  0x15   :  { %236 = vperm.xlu2 %1373, %v98_v12   ;;  %v635_v47 = vld [vmem:[%s1984_s4 + $0x68] sm:$0xff]  ;;  %v634_v48 = vld [vmem:[%s1984_s4 + $0x60] sm:$0xff]  ;;  %v637_v49 = vld [vmem:[%s1984_s4 + $0x78] sm:$0xff] }
  0x16   :  { %171 = vperm.xlu1 %1372, %v85_v13   ;;  %166 = vperm.xlu0 %1371, %v84_v14   ;;  %v1328_v50 = vld [vmem:[%s1981_s1 + $0x28] sm:$0xff]  ;;  %v1338_v51 = vld [vmem:[%s1981_s1 + $0x78] sm:$0xff]  ;;  %v630_v52 = vld [vmem:[%s1984_s4 + $0x40] sm:$0xff] }
  0x17   :  { %v633_v53 = vld [vmem:[%s1984_s4 + $0x58] sm:$0xff]  ;;  %v632_v54 = vld [vmem:[%s1984_s4 + $0x50] sm:$0xff]  ;;  %v631_v58 = vld [vmem:[%s1984_s4 + $0x48] sm:$0xff] }
  0x18   :  { %v629_v56 = vld [vmem:[%s1984_s4 + $0x38] sm:$0xff]  ;;  %v628_v57 = vld [vmem:[%s1984_s4 + $0x30] sm:$0xff]  ;;  %v627_v62 = vld [vmem:[%s1984_s4 + $0x28] sm:$0xff] }
  0x19   :  { %v1329_v59 = vld [vmem:[%s1981_s1 + $0x30] sm:$0xff]  ;;  %v626_v63 = vld [vmem:[%s1984_s4 + $0x20] sm:$0xff]  ;;  %v623_v2 = vld [vmem:[%s1984_s4 + $0x8] sm:$0xff] }
  0x1a   :  { %v624_v60 = vld [vmem:[%s1984_s4 + $0x10] sm:$0xff]  ;;  %v622_v3 = vld [vmem:[%s1984_s4] sm:$0xff]  ;;  %v625_v4 = vld [vmem:[%s1984_s4 + $0x18] sm:$0xff] }
  0x1b   :  { %v1330_v5 = vld [vmem:[%s1981_s1 + $0x38] sm:$0xff]  ;;  %v964_v9 = vld [vmem:[%s1986_s6 + $0x20] sm:$0xff]  ;;  %v966_v11 = vld [vmem:[%s1986_s6 + $0x30] sm:$0xff] }
  0x1c   :  { %v967_v10 = vld [vmem:[%s1986_s6 + $0x38] sm:$0xff] }
  0x1d   :  { %161 = vperm.xlu2 %1373, %v83_v16   ;;  %v962_v16 = vld [vmem:[%s1986_s6 + $0x10] sm:$0xff] }
  0x1e   :  { %241 = vperm.xlu0 %1371, %v99_v15   ;;  %156 = vperm.xlu1 %1372, %v82_v17   ;;  %v963_v15 = vld [vmem:[%s1986_s6 + $0x18] sm:$0xff]  ;;  %v965_v17 = vld [vmem:[%s1986_s6 + $0x28] sm:$0xff] }
  0x1f   :  { %1224 = vmatmul.msk.bf16.gmra.mxu0 %vm356_vm0, %v1324_v18  ;;  %1234 = vmatmul.msk.bf16.gmra.mxu3 %vm356_vm0, %v1334_v19  ;;  %v1331_v18 = vld [vmem:[%s1981_s1 + $0x40] sm:$0xff] }
  0x25   :  { %146 = vperm.xlu2 %1373, %v80_v20  }
  0x26   :  { %226 = vperm.xlu0 %1371, %v96_v21   ;;  %231 = vperm.xlu1 %1372, %v97_v22  }
  0x2d   :  { %221 = vperm.xlu2 %1373, %v95_v24   ;;  %v1107_v24 = vld [vmem:[#allocation2] sm:$0x1] }
  0x2e   :  { %216 = vperm.xlu1 %1372, %v94_v23   ;;  %151 = vperm.xlu0 %1371, %v81_v25   ;;  %v961_v25 = vld [vmem:[%s1986_s6 + $0x8] sm:$0xff] }
  0x2f   :  { %1225 = vmatmul.msk.bf16.gmra.mxu0 %vm356_vm0, %v1325_v26  ;;  %1235 = vmatmul.msk.bf16.gmra.mxu3 %vm356_vm0, %v1335_v27  ;;  %v960_v26 = vld [vmem:[%s1986_s6] sm:$0xff] }
  0x35   :  { %206 = vperm.xlu2 %1373, %v92_v28  }
  0x36   :  { %141 = vperm.xlu1 %1372, %v79_v29   ;;  %136 = vperm.xlu0 %1371, %v78_v30  }
  0x3d   :  { %131 = vperm.xlu2 %1373, %v77_v32   ;;  %v1332_v32 = vld [vmem:[%s1981_s1 + $0x48] sm:$0xff] }
  0x3e   :  { %211 = vperm.xlu0 %1371, %v93_v31   ;;  %126 = vperm.xlu1 %1372, %v76_v33  }
  0x3f   :  { %1226 = vmatmul.msk.bf16.gmra.mxu0 %vm356_vm0, %v1326_v34  ;;  %1236 = vmatmul.msk.bf16.gmra.mxu3 %vm356_vm0, %v1336_v35 }
  0x45   :  { %116 = vperm.xlu2 %1373, %v74_v36  }
  0x46   :  { %196 = vperm.xlu0 %1371, %v90_v37   ;;  %201 = vperm.xlu1 %1372, %v91_v38  }
  0x4d   :  { %191 = vperm.xlu2 %1373, %v89_v40  }
  0x4e   :  { %186 = vperm.xlu1 %1372, %v88_v39   ;;  %121 = vperm.xlu0 %1371, %v75_v41  }
  0x4f   :  { %1227 = vmatmul.msk.bf16.gmra.mxu0 %vm356_vm0, %v1327_v42  ;;  %1237 = vmatmul.msk.bf16.gmra.mxu3 %vm356_vm0, %v1337_v43 }
  0x55   :  { %710 = vperm.xlu2 %1373, %v636_v44  }
  0x56   :  { %111 = vperm.xlu1 %1372, %v73_v45   ;;  %106 = vperm.xlu0 %1371, %v72_v46  }
  0x5d   :  { %705 = vperm.xlu2 %1373, %v635_v47  }
  0x5e   :  { %700 = vperm.xlu1 %1372, %v634_v48   ;;  %715 = vperm.xlu0 %1371, %v637_v49  }
  0x5f   :  { %1228 = vmatmul.msk.bf16.gmra.mxu0 %vm356_vm0, %v1328_v50  ;;  %1238 = vmatmul.msk.bf16.gmra.mxu3 %vm356_vm0, %v1338_v51  ;;  %v1630_v55 = vpop.permute.xlu2 %246 }
  0x65   :  { %680 = vperm.xlu2 %1373, %v630_v52  }
  0x66   :  { %695 = vperm.xlu1 %1372, %v633_v53   ;;  %690 = vperm.xlu0 %1371, %v632_v54  }
  0x67   :  { %v1648_v61 = vpop.permute.xlu2 %251 }
  0x6d   :  { %675 = vperm.xlu2 %1373, %v629_v56  }
  0x6e   :  { %670 = vperm.xlu1 %1372, %v628_v57   ;;  %685 = vperm.xlu0 %1371, %v631_v58  }
  0x6f   :  { %1229 = vmatmul.msk.bf16.gmra.mxu0 %vm356_vm0, %v1329_v59  ;;  %v1672_v6 = vpop.permute.xlu2 %236 }
  0x75   :  { %650 = vperm.xlu2 %1373, %v624_v60  }
  0x76   :  { %665 = vperm.xlu1 %1372, %v627_v62   ;;  %660 = vperm.xlu0 %1371, %v626_v63  }
  0x77   :  { %v1688_v12 = vpop.permute.xlu2 %161 }
  0x78   :  { %v1656_v0 = vpop.permute.xlu0 %256  ;;  %v1658_v1 = vpop.permute.xlu1 %176 }
  0x7d   :  { %645 = vperm.xlu2 %1373, %v623_v2  }
  0x7e   :  { %640 = vperm.xlu1 %1372, %v622_v3   ;;  %655 = vperm.xlu0 %1371, %v625_v4  }
  0x7f   :  { %1230 = vmatmul.msk.bf16.gmra.mxu0 %vm356_vm0, %v1330_v5  ;;  %v1713_v22 = vpop.permute.xlu2 %146 }
  0x80   :  { %v1675_v7 = vpop.permute.xlu0 %261  ;;  %v1677_v8 = vpop.permute.xlu1 %181 }
  0x85   :  { %990 = vperm.xlu2 %1373, %v964_v9  }
  0x86   :  { %1005 = vperm.xlu1 %1372, %v967_v10   ;;  %1000 = vperm.xlu0 %1371, %v966_v11  }
  0x87   :  { %v222_v31 = vpop.permute.xlu2 %221 }
  0x88   :  { %v1690_v13 = vpop.permute.xlu1 %171  ;;  %v1692_v14 = vpop.permute.xlu0 %166 }
  0x8c   :  { %v1706_v19 = vpop.f32.mrf.mxu0 }
  0x8d   :  { %985 = vperm.xlu2 %1373, %v963_v15  }
  0x8e   :  { %980 = vperm.xlu1 %1372, %v962_v16   ;;  %995 = vperm.xlu0 %1371, %v965_v17  }
  0x8f   :  { %1231 = vmatmul.msk.bf16.gmra.mxu0 %vm356_vm0, %v1331_v18  ;;  %v207_v38 = vpop.permute.xlu2 %206 }
  0x90   :  { %v1709_v20 = vpop.permute.xlu0 %241  ;;  %v1711_v21 = vpop.permute.xlu1 %156 }
  0x92   :  { %v464_v23 = vpop.f32.mrf.mxu3 }
  0x93   :  { %v465_v44 = vadd.f32 %v464_v23, %v207_v38 }
  0x94   :  { %v1721_v27 = vpop.f32.mrf.mxu0 }
  0x95   :  { %1110 = vperm.xlu2 %1373, %v1107_v24   ;;  %v546_v49 = vmul.f32 0.2, %v465_v44  ;;  %vm514_vm3 = vcmp.gt.f32.partialorder %v465_v44, 0.0 }
  0x96   :  { %975 = vperm.xlu1 %1372, %v961_v25   ;;  %970 = vperm.xlu0 %1371, %v960_v26  }
  0x97   :  { %v132_v50 = vpop.permute.xlu2 %131  ;;  %v1741_v60 = vsel %vm514_vm3, %v465_v44, %v546_v49 }
  0x98   :  { %v1723_v28 = vpop.permute.xlu0 %226  ;;  %v1725_v29 = vpop.permute.xlu1 %231 }
  0x9a   :  { %v466_v30 = vpop.f32.mrf.mxu3 }
  0x9c   :  { %v419_v33 = vpop.f32.mrf.mxu0 }
  0x9f   :  { %1232 = vmatmul.msk.bf16.gmra.mxu0 %vm356_vm0, %v1332_v32  ;;  %v117_v16 = vpop.permute.xlu2 %116 }
  0xa0   :  { %v217_v34 = vpop.permute.xlu1 %216  ;;  %v1731_v35 = vpop.permute.xlu0 %151  ;;  %v420_v24 = vadd.f32 %v419_v33, %v117_v16 }
  0xa2   :  { %v469_v36 = vpop.f32.mrf.mxu3  ;;  %vm496_vm7 = vcmp.gt.f32.partialorder %v420_v24, 0.0 }
  0xa3   :  { %v470_v39 = vadd.f32 %v469_v36, %v217_v34 }
  0xa4   :  { %v421_v37 = vpop.f32.mrf.mxu0 }
  0xa5   :  { %v548_v42 = vmul.f32 0.2, %v470_v39  ;;  %vm516_vm1 = vcmp.gt.f32.partialorder %v470_v39, 0.0 }
  0xa7   :  { %v1733_v48 = vsel %vm516_vm1, %v470_v39, %v548_v42 }
  0xa8   :  { %v142_v40 = vpop.permute.xlu1 %141  ;;  %v137_v41 = vpop.permute.xlu0 %136 }
  0xaa   :  { %v471_v43 = vpop.f32.mrf.mxu3 }
  0xab   :  { %v472_v45 = vadd.f32 %v471_v43, %v222_v31 }
  0xac   :  { %v424_v46 = vpop.f32.mrf.mxu0 }
  0xad   :  { %v549_v47 = vmul.f32 0.2, %v472_v45  ;;  %vm517_vm2 = vcmp.gt.f32.partialorder %v472_v45, 0.0 }
  0xaf   :  { %v1735_v51 = vsel %vm517_vm2, %v472_v45, %v549_v47 }
  0xb0   :  { %v212_v52 = vpop.permute.xlu0 %211  ;;  %v127_v53 = vpop.permute.xlu1 %126  ;;  %v617_v54 = vpack.c.bf16 %v1735_v51, %v1733_v48 }
  0xb1   :  { %v467_v56 = vadd.f32 %v466_v30, %v212_v52  ;;  %v425_v57 = vadd.f32 %v424_v46, %v127_v53  ;;  %v528_v30 = vmul.f32 0.2, %v420_v24 }
  0xb2   :  { %v1739_v58 = vpop.f32.mrf.mxu3 }
  0xb3   :  { %v547_v59 = vmul.f32 0.2, %v467_v56  ;;  %vm515_vm4 = vcmp.gt.f32.partialorder %v467_v56, 0.0  ;;  %v530_v63 = vmul.f32 0.2, %v425_v57  ;;  %vm498_vm5 = vcmp.gt.f32.partialorder %v425_v57, 0.0 }
  0xb4   :  { %v426_v62 = vpop.f32.mrf.mxu0  ;;  %v1761_v43 = vsel %vm496_vm7, %v420_v24, %v528_v30 }
  0xb5   :  { %v427_v2 = vadd.f32 %v426_v62, %v132_v50  ;;  %v1743_v3 = vsel %vm515_vm4, %v467_v56, %v547_v59  ;;  %v1751_v11 = vsel %vm498_vm5, %v425_v57, %v530_v63 }
  0xb6   :  { %v616_v4 = vpack.c.bf16 %v1743_v3, %v1741_v60 }
  0xb7   :  { %v531_v5 = vmul.f32 0.2, %v427_v2  ;;  %vm499_vm6 = vcmp.gt.f32.partialorder %v427_v2, 0.0 }
  0xb8   :  { %v1747_v9 = vpop.permute.xlu0 %196  ;;  %v1749_v10 = vpop.permute.xlu1 %201 }
  0xb9   :  { %v1753_v15 = vsel %vm499_vm6, %v427_v2, %v531_v5 }
  0xba   :  { %v1755_v17 = vpop.f32.mrf.mxu3  ;;  %v608_v18 = vpack.c.bf16 %v1753_v15, %v1751_v11 }
  0xbc   :  { %v429_v23 = vpop.f32.mrf.mxu0 }
  0xbd   :  { %v430_v31 = vadd.f32 %v429_v23, %v137_v41 }
  0xbf   :  { %v532_v39 = vmul.f32 0.2, %v430_v31  ;;  %vm500_vm9 = vcmp.gt.f32.partialorder %v430_v31, 0.0 }
  0xc0   :  { %v1759_v25 = vpop.permute.xlu1 %186  ;;  %v122_v26 = vpop.permute.xlu0 %121 }
  0xc1   :  { %v422_v32 = vadd.f32 %v421_v37, %v122_v26  ;;  %v1769_v49 = vsel %vm500_vm9, %v430_v31, %v532_v39 }
  0xc2   :  { %v479_v34 = vpop.f32.mrf.mxu3 }
  0xc3   :  { %v529_v36 = vmul.f32 0.2, %v422_v32  ;;  %vm497_vm8 = vcmp.gt.f32.partialorder %v422_v32, 0.0 }
  0xc4   :  { %v431_v38 = vpop.f32.mrf.mxu0 }
  0xc5   :  { %v432_v42 = vadd.f32 %v431_v38, %v142_v40  ;;  %v1763_v44 = vsel %vm497_vm8, %v422_v32, %v529_v36  ;;  %v480_v38 = vadd.f32 %v479_v34, %v1672_v6 }
  0xc6   :  { %v607_v33 = vpack.c.bf16 %v1763_v44, %v1761_v43 }
  0xc7   :  { %v533_v45 = vmul.f32 0.2, %v432_v42  ;;  %vm501_vm10 = vcmp.gt.f32.partialorder %v432_v42, 0.0  ;;  %v552_v6 = vmul.f32 0.2, %v480_v38  ;;  %vm520_vm1 = vcmp.gt.f32.partialorder %v480_v38, 0.0 }
  0xc8   :  { %v112_v46 = vpop.permute.xlu1 %111  ;;  %v107_v41 = vpop.permute.xlu0 %106 }
  0xc9   :  { %v417_v37 = vadd.f32 %v1721_v27, %v112_v46  ;;  %v415_v47 = vadd.f32 %v1706_v19, %v107_v41  ;;  %v1771_v50 = vsel %vm501_vm10, %v432_v42, %v533_v45 }
  0xca   :  { %v481_v40 = vpop.f32.mrf.mxu3  ;;  %v609_v52 = vpack.c.bf16 %v1771_v50, %v1769_v49  ;;  %v1340_v49 = vld [vmem:[%s1983_s3 + $0x4] sm:$0xf0] }
  0xcb   :  { %v527_v53 = vmul.f32 0.2, %v417_v37  ;;  %v526_v56 = vmul.f32 0.2, %v415_v47  ;;  %vm494_vm11 = vcmp.gt.f32.partialorder %v415_v47, 0.0  ;;  %vm495_vm12 = vcmp.gt.f32.partialorder %v417_v37, 0.0 }
  0xcc   :  { %v1775_v57 = vpop.f32.mrf.mxu0  ;;  %v482_v45 = vadd.f32 %v481_v40, %v1709_v20 }
  0xcd   :  { %v1777_v59 = vsel %vm494_vm11, %v415_v47, %v526_v56  ;;  %v1779_v62 = vsel %vm495_vm12, %v417_v37, %v527_v53 }
  0xce   :  { %v606_v19 = vpack.c.bf16 %v1779_v62, %v1777_v59  ;;  %v553_v34 = vmul.f32 0.2, %v482_v45  ;;  %vm521_vm2 = vcmp.gt.f32.partialorder %v482_v45, 0.0 }
  0xd2   :  { %v484_v27 = vpop.f32.mrf.mxu3 }
  0xd3   :  { %v485_v26 = vadd.f32 %v484_v27, %v1630_v55 }
  0xd4   :  { %v1783_v63 = vpop.f32.mrf.mxu0 }
  0xd5   :  { %v554_v39 = vmul.f32 0.2, %v485_v26  ;;  %vm522_vm15 = vcmp.gt.f32.partialorder %v485_v26, 0.0 }
  0xd7   :  { %v586_v47 = vsel %vm522_vm15, %v485_v26, %v554_v39 }
  0xda   :  { %v486_v2 = vpop.f32.mrf.mxu3 }
  0xdb   :  { %v487_v30 = vadd.f32 %v486_v2, %v1648_v61  ;;  %v475_v61 = vadd.f32 %v1739_v58, %v1723_v28  ;;  %v584_v2 = vsel %vm520_vm1, %v480_v38, %v552_v6 }
  0xdc   :  { %v439_v5 = vpop.f32.mrf.mxu0 }
  0xdd   :  { %v555_v46 = vmul.f32 0.2, %v487_v30  ;;  %vm523_vm0 = vcmp.gt.f32.partialorder %v487_v30, 0.0  ;;  %v550_v56 = vmul.f32 0.2, %v475_v61  ;;  %vm518_vm3 = vcmp.gt.f32.partialorder %v475_v61, 0.0 }
  0xde   :  { %v440_v48 = vadd.f32 %v439_v5, %v1711_v21 }
  0xdf   :  { %v587_v53 = vsel %vm523_vm0, %v487_v30, %v555_v46  ;;  %v582_v58 = vsel %vm518_vm3, %v475_v61, %v550_v56  ;;  %v1342_v56 = vld [vmem:[%s1983_s3 + $0x14] sm:$0xf0] }
  0xe0   :  { %v620_v40 = vpack.c.bf16 %v587_v53, %v586_v47  ;;  %vm504_vm10 = vcmp.gt.f32.partialorder %v440_v48, 0.0  ;;  %v1241_v47 = vld [vmem:[%s1983_s3] sm:$0xf] }
  0xe2   :  { %v489_v16 = vpop.f32.mrf.mxu3 }
  0xe3   :  { %v490_v24 = vadd.f32 %v489_v16, %v1656_v0  ;;  %v585_v16 = vsel %vm521_vm2, %v482_v45, %v553_v34 }
  0xe4   :  { %v441_v23 = vpop.f32.mrf.mxu0  ;;  %v619_v28 = vpack.c.bf16 %v585_v16, %v584_v2  ;;  %v1341_v2 = vld [vmem:[%s1983_s3 + $0x14] sm:$0xf]  ;;  %v1251_v16 = vld [vmem:[%s1983_s3 + $0x18] sm:$0xf0] }
  0xe5   :  { %v556_v32 = vmul.f32 0.2, %v490_v24  ;;  %vm524_vm13 = vcmp.gt.f32.partialorder %v490_v24, 0.0  ;;  %v442_v39 = vadd.f32 %v441_v23, %v1688_v12  ;;  %v435_v12 = vadd.f32 %v1775_v57, %v1713_v22  ;;  %v192_v57 = vpop.permute.xlu2 %191 }
  0xe7   :  { %v588_v0 = vsel %vm524_vm13, %v490_v24, %v556_v32  ;;  %vm505_vm9 = vcmp.gt.f32.partialorder %v442_v39, 0.0  ;;  %vm502_vm12 = vcmp.gt.f32.partialorder %v435_v12, 0.0 }
  0xea   :  { %v491_v31 = vpop.f32.mrf.mxu3 }
  0xeb   :  { %v492_v36 = vadd.f32 %v491_v31, %v1675_v7  ;;  %v477_v7 = vadd.f32 %v1755_v17, %v1725_v29 }
  0xec   :  { %v444_v42 = vpop.f32.mrf.mxu0 }
  0xed   :  { %v557_v41 = vmul.f32 0.2, %v492_v36  ;;  %vm525_vm14 = vcmp.gt.f32.partialorder %v492_v36, 0.0  ;;  %v551_v27 = vmul.f32 0.2, %v477_v7  ;;  %vm519_vm4 = vcmp.gt.f32.partialorder %v477_v7, 0.0 }
  0xee   :  { %v445_v32 = vadd.f32 %v444_v42, %v1692_v14  ;;  %v537_v42 = vmul.f32 0.2, %v442_v39 }
  0xef   :  { %v589_v55 = vsel %vm525_vm14, %v492_v36, %v557_v41  ;;  %v583_v29 = vsel %vm519_vm4, %v477_v7, %v551_v27  ;;  %v534_v41 = vmul.f32 0.2, %v435_v12 }
  0xf0   :  { %v621_v37 = vpack.c.bf16 %v589_v55, %v588_v0  ;;  %v618_v24 = vpack.c.bf16 %v583_v29, %v582_v58  ;;  %vm506_vm8 = vcmp.gt.f32.partialorder %v445_v32, 0.0  ;;  %v569_v5 = vsel %vm505_vm9, %v442_v39, %v537_v42  ;;  %v1257_v58 = vld [vmem:[%s1983_s3 + $0x20] sm:$0xf]  ;;  %v1344_v29 = vld [vmem:[%s1983_s3 + $0x24] sm:$0xf0] }
  0xf1   :  { %v566_v61 = vsel %vm502_vm12, %v435_v12, %v534_v41  ;;  %v1267_v39 = vld [vmem:[%s1983_s3 + $0x38] sm:$0xf0]  ;;  %v1350_v42 = vld [vmem:[%s1983_s3 + $0x54] sm:$0xf0]  ;;  %v1906_v41 = vpop.permute.xlu1 %700 }
  0xf2   :  { %847 = vmatpush.bf16.msra.mxu2 %v621_v37  ;;  %v1283_v12 = vld [vmem:[%s1983_s3 + $0x58] sm:$0xf0] }
  0xf4   :  { %v446_v20 = vpop.f32.mrf.mxu0 }
  0xf5   :  { %v447_v30 = vadd.f32 %v446_v20, %v1690_v13  ;;  %v538_v13 = vmul.f32 0.2, %v445_v32  ;;  %v1243_v20 = vld [vmem:[%s1983_s3 + $0x8] sm:$0xf0] }
  0xf6   :  { %848 = vmatpush.bf16.msra.mxu2 %v620_v40 }
  0xf7   :  { %vm507_vm7 = vcmp.gt.f32.partialorder %v447_v30, 0.0  ;;  %v570_v23 = vsel %vm506_vm8, %v445_v32, %v538_v13  ;;  %v1346_v32 = vld [vmem:[%s1983_s3 + $0x34] sm:$0xf0] }
  0xfa   :  { %849 = vmatpush.bf16.msra.mxu2 %v619_v28  ;;  %v1254_v28 = vor.u32 %v1341_v2, %v1251_v16 }
  0xfc   :  { %v449_v17 = vpop.f32.mrf.mxu0 }
  0xfd   :  { %v450_v26 = vadd.f32 %v449_v17, %v1658_v1  ;;  %v539_v1 = vmul.f32 0.2, %v447_v30  ;;  %v1258_v17 = vor.u32 %v1344_v29, %v1257_v58 }
  0xfe   :  { %850 = vmatpush.bf16.msra.mxu2 %v618_v24  ;;  %v1343_v24 = vld [vmem:[%s1983_s3 + $0x24] sm:$0xf] }
  0xff   :  { %v540_v36 = vmul.f32 0.2, %v450_v26  ;;  %vm508_vm5 = vcmp.gt.f32.partialorder %v450_v26, 0.0  ;;  %v571_v60 = vsel %vm507_vm7, %v447_v30, %v539_v1 }
 0x100   :  { %v612_v46 = vpack.c.bf16 %v571_v60, %v570_v23  ;;  %v1289_v23 = vld [vmem:[%s1983_s3 + $0x60] sm:$0xf] }
 0x101   :  { %v572_v51 = vsel %vm508_vm5, %v450_v26, %v540_v36  ;;  %v1259_v26 = vld [vmem:[%s1983_s3 + $0x28] sm:$0xf0] }
 0x102   :  { %851 = vmatpush.bf16.msra.mxu2 %v617_v54  ;;  %v1262_v30 = vor.u32 %v1343_v24, %v1259_v26 }
 0x104   :  { %v451_v31 = vpop.f32.mrf.mxu0 }
 0x105   :  { %v452_v38 = vadd.f32 %v451_v31, %v1677_v8  ;;  %v437_v8 = vadd.f32 %v1783_v63, %v1731_v35  ;;  %v1265_v31 = vld [vmem:[%s1983_s3 + $0x30] sm:$0xf] }
 0x106   :  { %852 = vmatpush.bf16.msra.mxu2 %v616_v4  ;;  %v536_v4 = vmul.f32 0.2, %v440_v48  ;;  %v1266_v36 = vor.u32 %v1346_v32, %v1265_v31 }
 0x107   :  { %v541_v45 = vmul.f32 0.2, %v452_v38  ;;  %vm509_vm6 = vcmp.gt.f32.partialorder %v452_v38, 0.0  ;;  %v535_v21 = vmul.f32 0.2, %v437_v8  ;;  %vm503_vm11 = vcmp.gt.f32.partialorder %v437_v8, 0.0 }
 0x108   :  { %v568_v0 = vsel %vm504_vm10, %v440_v48, %v536_v4  ;;  %v1348_v48 = vld [vmem:[%s1983_s3 + $0x44] sm:$0xf0] }
 0x109   :  { %v573_v54 = vsel %vm509_vm6, %v452_v38, %v541_v45  ;;  %v611_v55 = vpack.c.bf16 %v569_v5, %v568_v0  ;;  %v567_v35 = vsel %vm503_vm11, %v437_v8, %v535_v21  ;;  %v1345_v38 = vld [vmem:[%s1983_s3 + $0x34] sm:$0xf]  ;;  %v1273_v45 = vld [vmem:[%s1983_s3 + $0x40] sm:$0xf]  ;;  %v1281_v8 = vld [vmem:[%s1983_s3 + $0x50] sm:$0xf]  ;;  %v1904_v5 = vpop.permute.xlu2 %710 }
 0x10a   :  { %v613_v14 = vpack.c.bf16 %v573_v54, %v572_v51  ;;  %v610_v7 = vpack.c.bf16 %v567_v35, %v566_v61  ;;  %v1270_v1 = vor.u32 %v1345_v38, %v1267_v39  ;;  %v1274_v13 = vor.u32 %v1348_v48, %v1273_v45  ;;  %v1347_v51 = vld [vmem:[%s1983_s3 + $0x44] sm:$0xf]  ;;  %v1275_v54 = vld [vmem:[%s1983_s3 + $0x48] sm:$0xf0]  ;;  %v1297_v61 = vld [vmem:[%s1983_s3 + $0x70] sm:$0xf] }
 0x10b   :  { %v1282_v60 = vor.u32 %v1350_v42, %v1281_v8  ;;  %v1351_v0 = vld [vmem:[%s1983_s3 + $0x64] sm:$0xf] }
 0x10c   :  { %v454_v3 = vpop.f32.mrf.mxu0  ;;  %798 = vmatpush.bf16.msra.mxu1 %v613_v14  ;;  %v1278_v14 = vor.u32 %v1347_v51, %v1275_v54 }
 0x10d   :  { %v455_v11 = vadd.f32 %v454_v3, %v1759_v25  ;;  %v1349_v3 = vld [vmem:[%s1983_s3 + $0x54] sm:$0xf] }
 0x10e   :  { %v1286_v4 = vor.u32 %v1349_v3, %v1283_v12 }
 0x10f   :  { %v542_v43 = vmul.f32 0.2, %v455_v11  ;;  %vm510_vm0 = vcmp.gt.f32.partialorder %v455_v11, 0.0 }
 0x110   :  { %799 = vmatpush.bf16.msra.mxu1 %v612_v46  ;;  %v1352_v46 = vld [vmem:[%s1983_s3 + $0x64] sm:$0xf0] }
 0x111   :  { %v574_v40 = vsel %vm510_vm0, %v455_v11, %v542_v43  ;;  %v1290_v21 = vor.u32 %v1352_v46, %v1289_v23  ;;  %v1932_v11 = vpop.permute.xlu0 %715 }
 0x114   :  { %v456_v63 = vpop.f32.mrf.mxu0  ;;  %800 = vmatpush.bf16.msra.mxu1 %v611_v55  ;;  %v1291_v55 = vld [vmem:[%s1983_s3 + $0x68] sm:$0xf0] }
 0x115   :  { %v457_v6 = vadd.f32 %v456_v63, %v192_v57  ;;  %v1294_v35 = vor.u32 %v1351_v0, %v1291_v55  ;;  %v1914_v63 = vpop.permute.xlu2 %705  ;;  %v1353_v57 = vld [vmem:[%s1983_s3 + $0x74] sm:$0xf] }
 0x117   :  { %vm511_vm15 = vcmp.gt.f32.partialorder %v457_v6, 0.0 }
 0x118   :  { %801 = vmatpush.bf16.msra.mxu1 %v610_v7  ;;  %v1354_v7 = vld [vmem:[%s1983_s3 + $0x74] sm:$0xf0] }
 0x11c   :  { %v459_v37 = vpop.f32.mrf.mxu0  ;;  %802 = vmatpush.bf16.msra.mxu1 %v609_v52  ;;  %v1242_v52 = vor.u32 %v1340_v49, %v1241_v47 }
 0x11d   :  { %v460_v22 = vadd.f32 %v459_v37, %v1747_v9  ;;  %v1922_v37 = vpop.permute.xlu1 %695 }
 0x11f   :  { %v544_v15 = vmul.f32 0.2, %v460_v22  ;;  %vm512_vm13 = vcmp.gt.f32.partialorder %v460_v22, 0.0 }
 0x120   :  { %803 = vmatpush.bf16.msra.mxu1 %v608_v18  ;;  %v543_v18 = vmul.f32 0.2, %v457_v6 }
 0x121   :  { %v576_v44 = vsel %vm512_vm13, %v460_v22, %v544_v15  ;;  %v1298_v22 = vor.u32 %v1354_v7, %v1297_v61 }
 0x122   :  { %v575_v25 = vsel %vm511_vm15, %v457_v6, %v543_v18  ;;  %v1299_v6 = vld [vmem:[%s1983_s3 + $0x78] sm:$0xf0] }
 0x123   :  { %v614_v59 = vpack.c.bf16 %v575_v25, %v574_v40  ;;  %v1302_v47 = vor.u32 %v1353_v57, %v1299_v6 }
 0x124   :  { %v461_v34 = vpop.f32.mrf.mxu0  ;;  %804 = vmatpush.bf16.msra.mxu1 %v607_v33 }
 0x125   :  { %v462_v9 = vadd.f32 %v461_v34, %v1749_v10  ;;  %v1339_v10 = vld [vmem:[%s1983_s3 + $0x4] sm:$0xf]  ;;  %v1930_v34 = vpop.permute.xlu2 %680  ;;  %v671_v49 = vpop.permute.xlu1 %670 }
 0x126   :  { %v1246_v62 = vor.u32 %v1339_v10, %v1243_v20 }
 0x127   :  { %v545_v50 = vmul.f32 0.2, %v462_v9  ;;  %vm513_vm14 = vcmp.gt.f32.partialorder %v462_v9, 0.0 }
 0x128   :  { %805 = vmatpush.bf16.msra.mxu1 %v606_v19  ;;  %v1249_v19 = vld [vmem:[%s1983_s3 + $0x10] sm:$0xf] }
 0x129   :  { %v577_v33 = vsel %vm513_vm14, %v462_v9, %v545_v50  ;;  %v1250_v27 = vor.u32 %v1342_v56, %v1249_v19  ;;  %v1934_v50 = vpop.permute.xlu0 %690 }
 0x12a   :  { %v615_v53 = vpack.c.bf16 %v577_v33, %v576_v44 }
 0x12b   :  { %806 = vmatmul.bf16.vlgmr.msra.gmra.mxu1 %v1242_v52 }
 0x12c   :  { %853 = vmatpush.bf16.msra.mxu2 %v615_v53 }
 0x12d   :  { %v676_v15 = vpop.permute.xlu2 %675  ;;  %v666_v18 = vpop.permute.xlu1 %665 }
 0x130   :  { %854 = vmatpush.bf16.msra.mxu2 %v614_v59 }
 0x131   :  { %v1936_v10 = vpop.permute.xlu0 %685 }
 0x133   :  { %855 = vmatmul.bf16.vlgmr.msra.gmra.mxu2 %v1246_v62 }
 0x135   :  { %v651_v43 = vpop.permute.xlu2 %650  ;;  %v641_v44 = vpop.permute.xlu1 %640 }
 0x139   :  { %v661_v16 = vpop.permute.xlu0 %660 }
 0x13b   :  { %811 = vmatmul.bf16.gmra.mxu1 %v1250_v27 }
 0x13d   :  { %v646_v40 = vpop.permute.xlu2 %645 }
 0x141   :  { %v656_v31 = vpop.permute.xlu0 %655 }
 0x143   :  { %860 = vmatmul.bf16.gmra.mxu2 %v1254_v28 }
 0x14b   :  { %816 = vmatmul.bf16.gmra.mxu1 %v1258_v17 }
 0x153   :  { %865 = vmatmul.bf16.gmra.mxu2 %v1262_v30 }
 0x15b   :  { %821 = vmatmul.bf16.gmra.mxu1 %v1266_v36 }
 0x163   :  { %870 = vmatmul.bf16.gmra.mxu2 %v1270_v1 }
 0x16b   :  { %826 = vmatmul.bf16.gmra.mxu1 %v1274_v13 }
 0x173   :  { %875 = vmatmul.bf16.gmra.mxu2 %v1278_v14 }
 0x17b   :  { %831 = vmatmul.bf16.gmra.mxu1 %v1282_v60 }
 0x183   :  { %880 = vmatmul.bf16.gmra.mxu2 %v1286_v4 }
 0x18b   :  { %836 = vmatmul.bf16.gmra.mxu1 %v1290_v21 }
 0x193   :  { %885 = vmatmul.bf16.gmra.mxu2 %v1294_v35 }
 0x19b   :  { %841 = vmatmul.bf16.gmra.mxu1 %v1298_v22 }
 0x1a3   :  { %890 = vmatmul.bf16.gmra.mxu2 %v1302_v47 }
 0x1a8   :  { %v807_v9 = vpop.f32.mrf.mxu1 }
 0x1a9   :  { %v808_v33 = vadd.f32 %v807_v9, %v641_v44 }
 0x1b0   :  { %v809_v52 = vpop.f32.mrf.mxu1 }
 0x1b1   :  { %v810_v59 = vadd.f32 %v809_v52, %v646_v40 }
 0x1b6   :  { %v856_v53 = vpop.f32.mrf.mxu2 }
 0x1b7   :  { %v857_v25 = vadd.f32 %v856_v53, %v808_v33 }
 0x1b8   :  { %v812_v20 = vpop.f32.mrf.mxu1 }
 0x1b9   :  { %v912_v19 = vmul.f32 0.2, %v857_v25  ;;  %vm896_vm1 = vcmp.gt.f32.partialorder %v857_v25, 0.0  ;;  %v813_v17 = vadd.f32 %v812_v20, %v651_v43 }
 0x1bb   :  { %v928_v28 = vsel %vm896_vm1, %v857_v25, %v912_v19 }
 0x1be   :  { %v858_v62 = vpop.f32.mrf.mxu2 }
 0x1bf   :  { %v859_v56 = vadd.f32 %v858_v62, %v810_v59 }
 0x1c0   :  { %v814_v27 = vpop.f32.mrf.mxu1 }
 0x1c1   :  { %v913_v2 = vmul.f32 0.2, %v859_v56  ;;  %vm897_vm2 = vcmp.gt.f32.partialorder %v859_v56, 0.0  ;;  %v815_v32 = vadd.f32 %v814_v27, %v656_v31 }
 0x1c3   :  { %v929_v58 = vsel %vm897_vm2, %v859_v56, %v913_v2 }
 0x1c4   :  { %v1938_v29 = vpack.c.bf16 %v929_v58, %v928_v28 }
 0x1c6   :  { %v861_v24 = vpop.f32.mrf.mxu2 }
 0x1c7   :  { %v862_v26 = vadd.f32 %v861_v24, %v813_v17 }
 0x1c8   :  { %v817_v30 = vpop.f32.mrf.mxu1 }
 0x1c9   :  { %v914_v38 = vmul.f32 0.2, %v862_v26  ;;  %vm898_vm3 = vcmp.gt.f32.partialorder %v862_v26, 0.0  ;;  %v818_v54 = vadd.f32 %v817_v30, %v661_v16 }
 0x1cb   :  { %v930_v48 = vsel %vm898_vm3, %v862_v26, %v914_v38 }
 0x1ce   :  { %v863_v36 = vpop.f32.mrf.mxu2 }
 0x1cf   :  { %v864_v39 = vadd.f32 %v863_v36, %v815_v32 }
 0x1d0   :  { %v819_v1 = vpop.f32.mrf.mxu1 }
 0x1d1   :  { %v915_v45 = vmul.f32 0.2, %v864_v39  ;;  %vm899_vm4 = vcmp.gt.f32.partialorder %v864_v39, 0.0  ;;  %v820_v60 = vadd.f32 %v819_v1, %v666_v18 }
 0x1d3   :  { %v931_v13 = vsel %vm899_vm4, %v864_v39, %v915_v45 }
 0x1d4   :  { %v1940_v51 = vpack.c.bf16 %v931_v13, %v930_v48 }
 0x1d6   :  { %v866_v14 = vpop.f32.mrf.mxu2 }
 0x1d7   :  { %v867_v8 = vadd.f32 %v866_v14, %v818_v54 }
 0x1d8   :  { %v822_v42 = vpop.f32.mrf.mxu1 }
 0x1d9   :  { %v916_v12 = vmul.f32 0.2, %v867_v8  ;;  %vm900_vm5 = vcmp.gt.f32.partialorder %v867_v8, 0.0  ;;  %v823_v35 = vadd.f32 %v822_v42, %v671_v49 }
 0x1db   :  { %v932_v21 = vsel %vm900_vm5, %v867_v8, %v916_v12 }
 0x1de   :  { %v868_v3 = vpop.f32.mrf.mxu2 }
 0x1df   :  { %v869_v4 = vadd.f32 %v868_v3, %v820_v60 }
 0x1e0   :  { %v824_v23 = vpop.f32.mrf.mxu1 }
 0x1e1   :  { %v917_v46 = vmul.f32 0.2, %v869_v4  ;;  %vm901_vm6 = vcmp.gt.f32.partialorder %v869_v4, 0.0  ;;  %v825_v57 = vadd.f32 %v824_v23, %v676_v15 }
 0x1e3   :  { %v933_v0 = vsel %vm901_vm6, %v869_v4, %v917_v46 }
 0x1e4   :  { %v1942_v55 = vpack.c.bf16 %v933_v0, %v932_v21 }
 0x1e6   :  { %v871_v61 = vpop.f32.mrf.mxu2 }
 0x1e7   :  { %v872_v7 = vadd.f32 %v871_v61, %v823_v35 }
 0x1e8   :  { %v827_v22 = vpop.f32.mrf.mxu1 }
 0x1e9   :  { %v918_v47 = vmul.f32 0.2, %v872_v7  ;;  %vm902_vm7 = vcmp.gt.f32.partialorder %v872_v7, 0.0  ;;  %v828_v53 = vadd.f32 %v827_v22, %v1930_v34  ;;  %v1356_v22 = vld [vmem:[%s1985_s5 + $0x8] sm:$0xff] }
 0x1eb   :  { %v934_v43 = vsel %vm902_vm7, %v872_v7, %v918_v47  ;;  %v1355_v7 = vld [vmem:[%s1985_s5] sm:$0xff] }
 0x1ee   :  { %v873_v6 = vpop.f32.mrf.mxu2 }
 0x1ef   :  { %v874_v9 = vadd.f32 %v873_v6, %v825_v57 }
 0x1f0   :  { %v829_v18 = vpop.f32.mrf.mxu1 }
 0x1f1   :  { %v919_v52 = vmul.f32 0.2, %v874_v9  ;;  %vm903_vm8 = vcmp.gt.f32.partialorder %v874_v9, 0.0 }
 0x1f3   :  { %v935_v44 = vsel %vm903_vm8, %v874_v9, %v919_v52  ;;  %v1001_v52 = vpop.permute.xlu0 %1000 }
 0x1f4   :  { %v1944_v33 = vpack.c.bf16 %v935_v44, %v934_v43  ;;  %v991_v43 = vpop.permute.xlu2 %990 }
 0x1f6   :  { %v876_v25 = vpop.f32.mrf.mxu2 }
 0x1f7   :  { %v877_v20 = vadd.f32 %v876_v25, %v828_v53 }
 0x1f8   :  { %v832_v49 = vpop.f32.mrf.mxu1 }
 0x1f9   :  { %v833_v45 = vadd.f32 %v832_v49, %v1934_v50  ;;  %vm904_vm0 = vcmp.gt.f32.partialorder %v877_v20, 0.0 }
 0x1fb   :  { %v996_v25 = vpop.permute.xlu0 %995 }
 0x1fe   :  { %v878_v40 = vpop.f32.mrf.mxu2 }
 0x200   :  { %v834_v59 = vpop.f32.mrf.mxu1 }
 0x201   :  { %v835_v36 = vadd.f32 %v834_v59, %v1922_v37 }
 0x206   :  { %v881_v62 = vpop.f32.mrf.mxu2 }
 0x208   :  { %v837_v15 = vpop.f32.mrf.mxu1 }
 0x209   :  { %v838_v34 = vadd.f32 %v837_v15, %v1906_v41  ;;  %v882_v41 = vadd.f32 %v881_v62, %v833_v45  ;;  %v986_v15 = vpop.permute.xlu2 %985 }
 0x20b   :  { %v922_v50 = vmul.f32 0.2, %v882_v41  ;;  %vm906_vm14 = vcmp.gt.f32.partialorder %v882_v41, 0.0 }
 0x20d   :  { %v938_v46 = vsel %vm906_vm14, %v882_v41, %v922_v50 }
 0x20e   :  { %v883_v19 = vpop.f32.mrf.mxu2 }
 0x20f   :  { %v884_v48 = vadd.f32 %v883_v19, %v835_v36 }
 0x210   :  { %v839_v56 = vpop.f32.mrf.mxu1 }
 0x211   :  { %v840_v24 = vadd.f32 %v839_v56, %v1914_v63  ;;  %v830_v63 = vadd.f32 %v829_v18, %v1936_v10  ;;  %v923_v42 = vmul.f32 0.2, %v884_v48  ;;  %vm907_vm13 = vcmp.gt.f32.partialorder %v884_v48, 0.0  ;;  %v1006_v18 = vpop.permute.xlu1 %1005 }
 0x212   :  { %v920_v10 = vmul.f32 0.2, %v877_v20 }
 0x213   :  { %v879_v37 = vadd.f32 %v878_v40, %v830_v63  ;;  %v939_v23 = vsel %vm907_vm13, %v884_v48, %v923_v42 }
 0x214   :  { %v957_v21 = vpack.c.bf16 %v939_v23, %v938_v46  ;;  %v936_v35 = vsel %vm904_vm0, %v877_v20, %v920_v10 }
 0x215   :  { %v921_v4 = vmul.f32 0.2, %v879_v37  ;;  %vm905_vm15 = vcmp.gt.f32.partialorder %v879_v37, 0.0 }
 0x216   :  { %v886_v27 = vpop.f32.mrf.mxu2 }
 0x217   :  { %v887_v38 = vadd.f32 %v886_v27, %v838_v34  ;;  %v937_v0 = vsel %vm905_vm15, %v879_v37, %v921_v4 }
 0x218   :  { %v842_v16 = vpop.f32.mrf.mxu1  ;;  %v956_v61 = vpack.c.bf16 %v937_v0, %v936_v35 }
 0x219   :  { %v843_v58 = vadd.f32 %v842_v16, %v1904_v5  ;;  %v924_v54 = vmul.f32 0.2, %v887_v38  ;;  %vm908_vm12 = vcmp.gt.f32.partialorder %v887_v38, 0.0 }
 0x21b   :  { %v940_v3 = vsel %vm908_vm12, %v887_v38, %v924_v54 }
 0x21e   :  { %v888_v2 = vpop.f32.mrf.mxu2 }
 0x21f   :  { %v889_v30 = vadd.f32 %v888_v2, %v840_v24 }
 0x220   :  { %v844_v17 = vpop.f32.mrf.mxu1 }
 0x221   :  { %v845_v31 = vadd.f32 %v844_v17, %v1932_v11  ;;  %v925_v5 = vmul.f32 0.2, %v889_v30  ;;  %vm909_vm11 = vcmp.gt.f32.partialorder %v889_v30, 0.0 }
 0x223   :  { %v941_v60 = vsel %vm909_vm11, %v889_v30, %v925_v5 }
 0x224   :  { %v958_v12 = vpack.c.bf16 %v941_v60, %v940_v3 }
 0x226   :  { %v891_v28 = vpop.f32.mrf.mxu2 }
 0x227   :  { %v892_v26 = vadd.f32 %v891_v28, %v843_v58 }
 0x229   :  { %v926_v39 = vmul.f32 0.2, %v892_v26  ;;  %vm910_vm9 = vcmp.gt.f32.partialorder %v892_v26, 0.0 }
 0x22b   :  { %v942_v14 = vsel %vm910_vm9, %v892_v26, %v926_v39  ;;  %vm1090_vm9 = vcmask 523264  }
 0x22e   :  { %v893_v32 = vpop.f32.mrf.mxu2 }
 0x22f   :  { %v894_v1 = vadd.f32 %v893_v32, %v845_v31  ;;  %v971_v32 = vpop.permute.xlu0 %970 }
 0x231   :  { %v927_v13 = vmul.f32 0.2, %v894_v1  ;;  %vm911_vm10 = vcmp.gt.f32.partialorder %v894_v1, 0.0 }
 0x233   :  { %v943_v11 = vsel %vm911_vm10, %v894_v1, %v927_v13 }
 0x234   :  { %v959_v8 = vpack.c.bf16 %v943_v11, %v942_v14  ;;  %v1085_v11 = vld [vmem:[%s1987_s7] sm:$0xf]  ;;  %s1405_s7 = smov [#allocation3]  }
 0x235   :  { %s1140_s30 = sshll.u32 %s1405_s7, 4  ;;  %s1141_s30 = int_to_ptr.vmem [resolvable:$true] %s1140_s30 }
 0x236   :  { %1032 = vmatpush.bf16.msrb.mxu1 %v959_v8  ;;  %1361 = vmatpush.bf16.msrb.mxu3 %v959_v8  ;;  %v1111_v8 = vpop.permute.xlu2 %1110 }
 0x237   :  { %v1113_v37 = vperm.slane %v1111_v8, 0 }
 0x23a   :  { %1033 = vmatpush.bf16.msrb.mxu1 %v958_v12  ;;  %1362 = vmatpush.bf16.msrb.mxu3 %v958_v12 }
 0x23e   :  { %1034 = vmatpush.bf16.msrb.mxu1 %v957_v21  ;;  %1363 = vmatpush.bf16.msrb.mxu3 %v957_v21 }
 0x242   :  { %1035 = vmatpush.bf16.msrb.mxu1 %v956_v61  ;;  %1364 = vmatpush.bf16.msrb.mxu3 %v956_v61 }
 0x246   :  { %1036 = vmatpush.bf16.msrb.mxu1 %v1944_v33  ;;  %1365 = vmatpush.bf16.msrb.mxu3 %v1944_v33  ;;  %v981_v33 = vpop.permute.xlu1 %980 }
 0x24a   :  { %1037 = vmatpush.bf16.msrb.mxu1 %v1942_v55  ;;  %1366 = vmatpush.bf16.msrb.mxu3 %v1942_v55  ;;  %v1357_v55 = vld [vmem:[%s1985_s5 + $0x10] sm:$0xff] }
 0x24e   :  { %1038 = vmatpush.bf16.msrb.mxu1 %v1940_v51  ;;  %1367 = vmatpush.bf16.msrb.mxu3 %v1940_v51  ;;  %v1358_v51 = vld [vmem:[%s1985_s5 + $0x18] sm:$0xff]  ;;  %v976_v24 = vpop.permute.xlu1 %975 }
 0x252   :  { %1039 = vmatpush.bf16.msrb.mxu1 %v1938_v29  ;;  %1368 = vmatpush.bf16.msrb.mxu3 %v1938_v29 }
 0x255   :  { %1040 = vmatmul.bf16.vlgmr.msrb.gmra.mxu1 %v1355_v7  ;;  %1045 = vmatmul.bf16.vlgmr.msrb.gmra.mxu3 %v1356_v22 }
 0x265   :  { %1050 = vmatmul.bf16.gmra.mxu3 %v1357_v55 }
 0x275   :  { %1055 = vmatmul.bf16.gmra.mxu3 %v1358_v51 }
 0x2d2   :  { %v1041_v44 = vpop.f32.mrf.mxu1 }
 0x2d3   :  { %v1042_v36 = vadd.f32 %v1041_v44, %v971_v32 }
 0x2d5   :  { %v1069_v5 = vmul.f32 0.2, %v1042_v36  ;;  %vm1061_vm8 = vcmp.gt.f32.partialorder %v1042_v36, 0.0 }
 0x2d7   :  { %v1077_v54 = vsel %vm1061_vm8, %v1042_v36, %v1069_v5 }
 0x2d8   :  { %v1046_v57 = vpop.f32.mrf.mxu3 }
 0x2d9   :  { %v1047_v16 = vadd.f32 %v1046_v57, %v981_v33 }
 0x2da   :  { %v1043_v2 = vpop.f32.mrf.mxu1 }
 0x2db   :  { %v1044_v34 = vadd.f32 %v1043_v2, %v976_v24  ;;  %v1071_v38 = vmul.f32 0.2, %v1047_v16  ;;  %vm1063_vm6 = vcmp.gt.f32.partialorder %v1047_v16, 0.0 }
 0x2dd   :  { %v1070_v45 = vmul.f32 0.2, %v1044_v34  ;;  %vm1062_vm7 = vcmp.gt.f32.partialorder %v1044_v34, 0.0  ;;  %v1079_v13 = vsel %vm1063_vm6, %v1047_v16, %v1071_v38 }
 0x2df   :  { %v1078_v41 = vsel %vm1062_vm7, %v1044_v34, %v1070_v45 }
 0x2e0   :  { %v1048_v6 = vpop.f32.mrf.mxu3  ;;  %v1086_v14 = vpack.c.bf16 %v1078_v41, %v1077_v54 }
 0x2e1   :  { %v1049_v19 = vadd.f32 %v1048_v6, %v986_v15 }
 0x2e3   :  { %v1072_v30 = vmul.f32 0.2, %v1049_v19  ;;  %vm1064_vm5 = vcmp.gt.f32.partialorder %v1049_v19, 0.0 }
 0x2e5   :  { %v1080_v48 = vsel %vm1064_vm5, %v1049_v19, %v1072_v30 }
 0x2e6   :  { %v1087_v63 = vpack.c.bf16 %v1080_v48, %v1079_v13 }
 0x2e8   :  { %v1051_v47 = vpop.f32.mrf.mxu3 }
 0x2e9   :  { %v1052_v40 = vadd.f32 %v1051_v47, %v991_v43 }
 0x2eb   :  { %v1073_v28 = vmul.f32 0.2, %v1052_v40  ;;  %vm1065_vm4 = vcmp.gt.f32.partialorder %v1052_v40, 0.0 }
 0x2ed   :  { %v1081_v39 = vsel %vm1065_vm4, %v1052_v40, %v1073_v28 }
 0x2f0   :  { %v1053_v9 = vpop.f32.mrf.mxu3 }
 0x2f1   :  { %v1054_v20 = vadd.f32 %v1053_v9, %v996_v25 }
 0x2f3   :  { %v1074_v56 = vmul.f32 0.2, %v1054_v20  ;;  %vm1066_vm3 = vcmp.gt.f32.partialorder %v1054_v20, 0.0 }
 0x2f5   :  { %v1082_v31 = vsel %vm1066_vm3, %v1054_v20, %v1074_v56 }
 0x2f6   :  { %v1088_v1 = vpack.c.bf16 %v1082_v31, %v1081_v39 }
 0x2f8   :  { %v1056_v29 = vpop.f32.mrf.mxu3 }
 0x2f9   :  { %v1057_v53 = vadd.f32 %v1056_v29, %v1001_v52 }
 0x2fb   :  { %v1075_v59 = vmul.f32 0.2, %v1057_v53  ;;  %vm1067_vm1 = vcmp.gt.f32.partialorder %v1057_v53, 0.0 }
 0x2fd   :  { %v1083_v58 = vsel %vm1067_vm1, %v1057_v53, %v1075_v59 }
 0x300   :  { %v1058_v49 = vpop.f32.mrf.mxu3 }
 0x301   :  { %v1059_v62 = vadd.f32 %v1058_v49, %v1006_v18 }
 0x303   :  { %vm1068_vm2 = vcmp.gt.f32.partialorder %v1059_v62, 0.0  ;;  %v1076_v27 = vmul.f32 0.2, %v1059_v62 }
 0x305   :  { %v1084_v17 = vsel %vm1068_vm2, %v1059_v62, %v1076_v27 }
 0x306   :  { %v1089_v26 = vpack.c.bf16 %v1084_v17, %v1083_v58 }
 0x308   :  { %1098 = vmatpush.bf16.msra.mxu3 %v1089_v26 }
 0x30c   :  { %1099 = vmatpush.bf16.msra.mxu3 %v1088_v1 }
 0x310   :  { %1100 = vmatpush.bf16.msra.mxu3 %v1087_v63 }
 0x314   :  { %1101 = vmatpush.bf16.msra.mxu3 %v1086_v14 }
 0x317   :  { %1319 = vmatmul.msk.bf16.vlgmr.msra.gmra.mxu3 %vm1090_vm9, %v1085_v11 }
 0x39a   :  { %v1103_v42 = vpop.f32.mrf.mxu3 }
 0x39b   :  { %v1114_v60 = vadd.f32 %v1113_v37, %v1103_v42 }
 0x39d   :  { %v1320_v50 = vmul.f32 -1.442695, %v1114_v60 }
 0x39f   :  { %1374 = vpow2.f32 %v1320_v50 }
 0x3a2   :  { %v1105_v3 = vpop.f32.mrf.mxu3 }
 0x3a5   :  { %v1375_v12 = vpop.eup %1374 }
 0x3a6   :  { %v1118_v4 = vadd.f32 1.0, %v1375_v12 }
 0x3a8   :  { %1376 = vrcp.f32 %v1118_v4  ;;  %v1130_v21 = vand.u32 2147483648, %v1118_v4  ;;  %v1128_v35 = vand.u32 2147483647, %v1118_v4  ;;  %vm1124_vm11 = vweird.f32 %v1118_v4 }
 0x3aa   :  { %v1131_v7 = vor.u32 1.1754944e-38, %v1130_v21  ;;  %vm1129_vm13 = vcmp.eq.f32.partialorder %v1128_v35, 8.507059e+37 }
 0x3ae   :  { %v1377_v23 = vpop.eup %1376 }
 0x3af   :  { %v1120_v10 = vmul.f32 %v1377_v23, %v1118_v4  ;;  %vm1125_vm10 = vweird.f32 %v1377_v23 }
 0x3b0   :  { %vm1126_vm12 = vmor %vm1124_vm11, %vm1125_vm10 }
 0x3b1   :  { %v1121_v46 = vsub.f32 1.0, %v1120_v10 }
 0x3b3   :  { %v1122_v0 = vmul.f32 %v1377_v23, %v1121_v46 }
 0x3b5   :  { %v1123_v61 = vadd.f32 %v1377_v23, %v1122_v0 }
 0x3b7   :  { %v1127_v22 = vsel %vm1126_vm12, %v1377_v23, %v1123_v61 }
 0x3b8   :  { %v1132_v55 = vsel %vm1129_vm13, %v1131_v7, %v1127_v22 }
 0x3b9   :  { %1134 = vst [vmem:[#allocation3] sm:$0x1] %v1132_v55 }
 0x3ba   :  { %1145 = dma.vmem_to_hbm [thread:$0]  %s1141_s30, 16, %s1143_s12, [#allocation4]  }
 0x3bb   :  { %1402 = dma.done.wait [#allocation4], 16  }
 0x3bc   :  { %1403 = vsyncadd [#allocation4], 4294967280 }
 0x3bd   :  { %1150 = vsyncpa [#allocation4], 1 }

</bundles_post_ra>
